<compile_context>
chip_gen: v5e
topology: v5e:2x2
jax: 0.10.0
libtpu: 0.0.40
codegen_flags: <defaults>
</compile_context>

<pallas_src>
import jax
import jax.numpy as jnp
from jax.experimental import pallas as pl
from jax.experimental.pallas import tpu as pltpu


def _policy_mean_kernel(x_ref, w1_ref, b1_ref, w2_ref, b2_ref, w3_ref, b3_ref,
                        mean_ref):
    # fc1 + tanh
    h1 = jnp.tanh(
        jnp.dot(x_ref[...], w1_ref[...], preferred_element_type=jnp.float32)
        + b1_ref[...])
    # fc2 + tanh
    h2 = jnp.tanh(
        jnp.dot(h1, w2_ref[...], preferred_element_type=jnp.float32)
        + b2_ref[...])
    # fc3 -> action mean
    mean_ref[...] = (
        jnp.dot(h2, w3_ref[...], preferred_element_type=jnp.float32)
        + b3_ref[...]).astype(mean_ref.dtype)
    # TODO(synk): for very large batched paths, pad the mean output's last dim
    # to 128 lanes (slice in the wrapper) so stores are unmasked vst.


def policy_forward(x, params, *, tile_b=512):
    """Returns (action_mean, sigma) — the parameters of Normal(action_mean, sigma).

    params = (w1_t, b1, w2_t, b2, w3_t, b3, sigma_param) with weights stored
    as (in, out) and biases as (1, out).
    """
    w1_t, b1_r, w2_t, b2_r, w3_t, b3_r, sigma_param = params
    batch, state_space = x.shape
    hidden = w1_t.shape[1]
    action_space = w3_t.shape[1]

    # Input-independent; stable softplus (log(1 + exp(s)) without overflow).
    sigma = jnp.logaddexp(sigma_param, 0.0)

    # Choose the batch tiling.  Small rollout batches: one grid step covering
    # the whole array (no padding).  Large batches: tile_b-row tiles (multiple
    # of 8 sublanes), padded batch, "parallel" semantics for megacore sharding.
    if batch <= tile_b:
        tb = batch
        x_pad = x
    else:
        tb = tile_b
        pad = (-batch) % tb
        x_pad = jnp.pad(x, ((0, pad), (0, 0))) if pad else x
    grid = (x_pad.shape[0] // tb,)

    rep = lambda i: (0, 0)            # weights/biases resident across the grid
    in_specs = [
        pl.BlockSpec((tb, state_space), lambda i: (i, 0)),      # x tile
        pl.BlockSpec((state_space, hidden), rep),               # w1 (in, out)
        pl.BlockSpec((1, hidden), rep),                         # b1
        pl.BlockSpec((hidden, hidden), rep),                    # w2
        pl.BlockSpec((1, hidden), rep),                         # b2
        pl.BlockSpec((hidden, action_space), rep),              # w3
        pl.BlockSpec((1, action_space), rep),                   # b3
    ]
    out_spec = pl.BlockSpec((tb, action_space), lambda i: (i, 0))

    mean = pl.pallas_call(
        _policy_mean_kernel,
        out_shape=jax.ShapeDtypeStruct((x_pad.shape[0], action_space),
                                       jnp.float32),
        grid_spec=pltpu.PrefetchScalarGridSpec(
            num_scalar_prefetch=0,
            grid=grid,
            in_specs=in_specs,
            out_specs=out_spec,
        ),
        compiler_params=pltpu.CompilerParams(
            dimension_semantics=("parallel",)),
    )(x_pad, w1_t, b1_r, w2_t, b2_r, w3_t, b3_r)

    if mean.shape[0] != batch:
        mean = mean[:batch]
    return mean, sigma


def init_params(key, state_space, action_space, hidden=64):
    """Matches Policy.init_weights(): N(0,1) weights, zero biases, sigma=0.5.

    Weights are stored already transposed as (in, out); biases as (1, out)
    so the forward pass does no per-call layout work.
    """
    k1, k2, k3 = jax.random.split(key, 3)
    w1_t = jax.random.normal(k1, (state_space, hidden), dtype=jnp.float32)
    b1 = jnp.zeros((1, hidden), dtype=jnp.float32)
    w2_t = jax.random.normal(k2, (hidden, hidden), dtype=jnp.float32)
    b2 = jnp.zeros((1, hidden), dtype=jnp.float32)
    w3_t = jax.random.normal(k3, (hidden, action_space), dtype=jnp.float32)
    b3 = jnp.zeros((1, action_space), dtype=jnp.float32)
    sigma_param = jnp.full((action_space,), 0.5, dtype=jnp.float32)
    return (w1_t, b1, w2_t, b2, w3_t, b3, sigma_param)


def _reference(x, params):
    w1_t, b1, w2_t, b2, w3_t, b3, sigma_param = params
    h = jnp.tanh(x @ w1_t + b1)
    h = jnp.tanh(h @ w2_t + b2)
    mean = h @ w3_t + b3
    sigma = jnp.logaddexp(sigma_param, 0.0)
    return mean, sigma


if __name__ == "__main__":
    # Hopper-like dims: state_space=11, action_space=3.
    state_space, action_space = 11, 3
    key = jax.random.PRNGKey(0)
    kx, kp, kb = jax.random.split(key, 3)
    params = init_params(kp, state_space, action_space)

    # --- small rollout-style batch (single grid step) ---
    batch = 8
    x = jax.random.normal(kx, (batch, state_space), dtype=jnp.float32)
    mean, sigma = jax.block_until_ready(policy_forward(x, params))
    ref_mean, ref_sigma = _reference(x, params)
    assert jnp.allclose(mean, ref_mean, atol=1e-5, rtol=1e-5)
    assert jnp.allclose(sigma, ref_sigma, atol=1e-5, rtol=1e-5)

    # --- batched path (grid over batch, with padding) ---
    big_batch = 640
    xb = jax.random.normal(kb, (big_batch, state_space), dtype=jnp.float32)
    mean_b, sigma_b = jax.block_until_ready(
        policy_forward(xb, params, tile_b=256))
    ref_mean_b, _ = _reference(xb, params)
    assert mean_b.shape == (big_batch, action_space)
    assert jnp.allclose(mean_b, ref_mean_b, atol=1e-5, rtol=1e-5)

    # TODO(synk): Normal(action_mean, sigma) distribution object / sampling is
    # left to the caller; the kernel produces its parameters.
    print("KERNEL_OK")
</pallas_src>

<mosaic_0001>
module attributes {stable_mosaic.version = 11 : i64} {
  func.func @_policy_mean_kernel(%arg0: i32, %arg1: memref<8x11xf32, #tpu.memory_space<vmem>>, %arg2: memref<11x64xf32, #tpu.memory_space<vmem>>, %arg3: memref<1x64xf32, #tpu.memory_space<vmem>>, %arg4: memref<64x64xf32, #tpu.memory_space<vmem>>, %arg5: memref<1x64xf32, #tpu.memory_space<vmem>>, %arg6: memref<64x3xf32, #tpu.memory_space<vmem>>, %arg7: memref<1x3xf32, #tpu.memory_space<vmem>>, %arg8: memref<8x3xf32, #tpu.memory_space<vmem>>) attributes {dimension_semantics = [#tpu.dimension_semantics<parallel>], iteration_bounds = array<i64: 1>, scalar_prefetch = 0 : i64, scratch_operands = 0 : i64, tpu.core_type = #tpu.core_type<tc>, window_params = [{transform_indices = @transform_0, window_bounds = array<i64: 8, 11>}, {pipeline_mode = #tpu.pipeline_mode<synchronous>, transform_indices = @transform_1, window_bounds = array<i64: 11, 64>}, {pipeline_mode = #tpu.pipeline_mode<synchronous>, transform_indices = @transform_2, window_bounds = array<i64: 1, 64>}, {pipeline_mode = #tpu.pipeline_mode<synchronous>, transform_indices = @transform_3, window_bounds = array<i64: 64, 64>}, {pipeline_mode = #tpu.pipeline_mode<synchronous>, transform_indices = @transform_4, window_bounds = array<i64: 1, 64>}, {pipeline_mode = #tpu.pipeline_mode<synchronous>, transform_indices = @transform_5, window_bounds = array<i64: 64, 3>}, {pipeline_mode = #tpu.pipeline_mode<synchronous>, transform_indices = @transform_6, window_bounds = array<i64: 1, 3>}, {transform_indices = @transform_7, window_bounds = array<i64: 8, 3>}]} {
    %c0 = arith.constant 0 : index
    %c0_0 = arith.constant 0 : index
    %0 = vector.load %arg1[%c0, %c0_0] : memref<8x11xf32, #tpu.memory_space<vmem>>, vector<8x11xf32>
    %c0_1 = arith.constant 0 : index
    %c0_2 = arith.constant 0 : index
    %1 = vector.load %arg2[%c0_1, %c0_2] : memref<11x64xf32, #tpu.memory_space<vmem>>, vector<11x64xf32>
    %cst = arith.constant dense<0.000000e+00> : vector<8x64xf32>
    %2 = tpu.matmul %0, %1, %cst {dimension_numbers = #tpu.dot_dimension_numbers<[1], [0], [0], [1], [0, 0, 1, 1], [], []>} : vector<8x11xf32>, vector<11x64xf32>, vector<8x64xf32> -> vector<8x64xf32>
    %c0_3 = arith.constant 0 : index
    %c0_4 = arith.constant 0 : index
    %3 = vector.load %arg3[%c0_3, %c0_4] : memref<1x64xf32, #tpu.memory_space<vmem>>, vector<1x64xf32>
    %4 = vector.broadcast %3 : vector<1x64xf32> to vector<8x64xf32>
    %5 = arith.addf %2, %4 : vector<8x64xf32>
    %6 = math.tanh %5 : vector<8x64xf32>
    %c0_5 = arith.constant 0 : index
    %c0_6 = arith.constant 0 : index
    %7 = vector.load %arg4[%c0_5, %c0_6] : memref<64x64xf32, #tpu.memory_space<vmem>>, vector<64x64xf32>
    %cst_7 = arith.constant dense<0.000000e+00> : vector<8x64xf32>
    %8 = tpu.matmul %6, %7, %cst_7 {dimension_numbers = #tpu.dot_dimension_numbers<[1], [0], [0], [1], [0, 0, 1, 1], [], []>} : vector<8x64xf32>, vector<64x64xf32>, vector<8x64xf32> -> vector<8x64xf32>
    %c0_8 = arith.constant 0 : index
    %c0_9 = arith.constant 0 : index
    %9 = vector.load %arg5[%c0_8, %c0_9] : memref<1x64xf32, #tpu.memory_space<vmem>>, vector<1x64xf32>
    %10 = vector.broadcast %9 : vector<1x64xf32> to vector<8x64xf32>
    %11 = arith.addf %8, %10 : vector<8x64xf32>
    %12 = math.tanh %11 : vector<8x64xf32>
    %c0_10 = arith.constant 0 : index
    %c0_11 = arith.constant 0 : index
    %13 = vector.load %arg6[%c0_10, %c0_11] : memref<64x3xf32, #tpu.memory_space<vmem>>, vector<64x3xf32>
    %cst_12 = arith.constant dense<0.000000e+00> : vector<8x3xf32>
    %14 = tpu.matmul %12, %13, %cst_12 {dimension_numbers = #tpu.dot_dimension_numbers<[1], [0], [0], [1], [0, 0, 1, 1], [], []>} : vector<8x64xf32>, vector<64x3xf32>, vector<8x3xf32> -> vector<8x3xf32>
    %c0_13 = arith.constant 0 : index
    %c0_14 = arith.constant 0 : index
    %15 = vector.load %arg7[%c0_13, %c0_14] : memref<1x3xf32, #tpu.memory_space<vmem>>, vector<1x3xf32>
    %16 = vector.broadcast %15 : vector<1x3xf32> to vector<8x3xf32>
    %17 = arith.addf %14, %16 : vector<8x3xf32>
    %c0_15 = arith.constant 0 : index
    %c0_16 = arith.constant 0 : index
    %18 = vector.load %arg8[%c0_15, %c0_16] : memref<8x3xf32, #tpu.memory_space<vmem>>, vector<8x3xf32>
    tpu.vector_store %arg8[%c0_15, %c0_16], %17 {strides = array<i32>} : memref<8x3xf32, #tpu.memory_space<vmem>>, vector<8x3xf32>,
    return
  }
  func.func @transform_0(%arg0: i32) -> (i32, i32) {
    %c0_i32 = arith.constant 0 : i32
    %c0_i32_0 = arith.constant 0 : i32
    return %arg0, %c0_i32 : i32, i32
  }
  func.func @transform_1(%arg0: i32) -> (i32, i32) {
    %c0_i32 = arith.constant 0 : i32
    %c0_i32_0 = arith.constant 0 : i32
    %c0_i32_1 = arith.constant 0 : i32
    return %c0_i32, %c0_i32_0 : i32, i32
  }
  func.func @transform_2(%arg0: i32) -> (i32, i32) {
    %c0_i32 = arith.constant 0 : i32
    %c0_i32_0 = arith.constant 0 : i32
    %c0_i32_1 = arith.constant 0 : i32
    return %c0_i32, %c0_i32_0 : i32, i32
  }
  func.func @transform_3(%arg0: i32) -> (i32, i32) {
    %c0_i32 = arith.constant 0 : i32
    %c0_i32_0 = arith.constant 0 : i32
    %c0_i32_1 = arith.constant 0 : i32
    return %c0_i32, %c0_i32_0 : i32, i32
  }
  func.func @transform_4(%arg0: i32) -> (i32, i32) {
    %c0_i32 = arith.constant 0 : i32
    %c0_i32_0 = arith.constant 0 : i32
    %c0_i32_1 = arith.constant 0 : i32
    return %c0_i32, %c0_i32_0 : i32, i32
  }
  func.func @transform_5(%arg0: i32) -> (i32, i32) {
    %c0_i32 = arith.constant 0 : i32
    %c0_i32_0 = arith.constant 0 : i32
    %c0_i32_1 = arith.constant 0 : i32
    return %c0_i32, %c0_i32_0 : i32, i32
  }
  func.func @transform_6(%arg0: i32) -> (i32, i32) {
    %c0_i32 = arith.constant 0 : i32
    %c0_i32_0 = arith.constant 0 : i32
    %c0_i32_1 = arith.constant 0 : i32
    return %c0_i32, %c0_i32_0 : i32, i32
  }
  func.func @transform_7(%arg0: i32) -> (i32, i32) {
    %c0_i32 = arith.constant 0 : i32
    %c0_i32_0 = arith.constant 0 : i32
    return %arg0, %c0_i32 : i32, i32
  }
}

</mosaic_0001>

<bundles_post_ra>
// kernel: tpu_custom_call.1
= control target key start
LH: loop header
LB: loop body
LE: loop exit
PB: predicated region body
PF: predicated region fallthrough
CT: control target
= control target key end

     0   :  { %12 = vsyncpa [#allocation3], 0  ;;  %s351_s0 = inlined_call_operand.hbm [shape: f32[8,11], index: 0, kind: input, shape index: {}]   ;;  %s352_s1 = inlined_call_operand.hbm [shape: f32[11,64], index: 1, kind: input, shape index: {}]   ;;  %s353_s2 = inlined_call_operand.vmem [shape: f32[1,64], index: 2, kind: input, shape index: {}]   ;;  %s354_s3 = inlined_call_operand.vmem [shape: f32[64,64], index: 3, kind: input, shape index: {}]   ;;  %s355_s4 = inlined_call_operand.vmem [shape: f32[1,64], index: 4, kind: input, shape index: {}]   ;;  %s356_s5 = inlined_call_operand.vmem [shape: f32[64,3], index: 5, kind: input, shape index: {}]   ;;  %s357_s6 = inlined_call_operand.vmem [shape: f32[1,3], index: 6, kind: input, shape index: {}]   ;;  %s358_s7 = inlined_call_operand.vmem [shape: f32[8,3], index: 7, kind: output, shape index: {}]  }
   0x1   :  { %s19_s26 = sshll.u32 %s351_s0, 4  ;;  %s20_s26 = int_to_ptr.hbm [resolvable:$true] %s19_s26 }
   0x2   :  { %13 = vsyncpa [#allocation5], 0  ;;  %s239_s27 = smov [#allocation2]   ;;  %s29_s8 = sshll.u32 %s352_s1, 4  ;;  %s30_s8 = int_to_ptr.hbm [resolvable:$true] %s29_s8 }
   0x3   :  { %s21_s28 = sshll.u32 %s239_s27, 4  ;;  %s240_s9 = smov [#allocation4]   ;;  %s22_s28 = int_to_ptr.vmem [resolvable:$true] %s21_s28 }
   0x4   :  { %24 = dma.hbm_to_vmem [thread:$0]  %s20_s26, 128, %s22_s28, [#allocation3]  }
   0x5   :  { %s31_s10 = sshll.u32 %s240_s9, 4  ;;  %s241_s11 = smov 128   ;;  %s32_s10 = int_to_ptr.vmem [resolvable:$true] %s31_s10 }
   0x6   :  { %s242_s12 = smov 8  }
   0x7   :  { %37 = dma.hbm_to_vmem [thread:$0]  %s30_s8, 256, %s32_s10, [#allocation5], %s241_s11, %s241_s11, %s242_s12  }
   0x8   :  { %235 = dma.done.wait [#allocation3], 128  }
   0x9   :  { %236 = vsyncadd [#allocation3], 4294967168 }
   0xa   :  { %237 = dma.done.wait [#allocation5], 256  }
   0xb   :  { %238 = vsyncadd [#allocation5], 4294967040  ;;  %vm67_vm0 = vcmask 1042432   ;;  %v58_v0 = vld [vmem:[#allocation4 + $0x8] sm:$0x7]  ;;  %v57_v1 = vld [vmem:[#allocation4] sm:$0xff] }
   0xc   :  { %172 = vmatpush.msk.msra.mxu0 %vm67_vm0, %v58_v0  ;;  %v56_v2 = vld [vmem:[#allocation2] sm:$0xff]  ;;  %vm63_vm1 = vcmask 89088   ;;  %v99_v3 = vld [vmem:[%s354_s3 + $0x38] sm:$0xff]  ;;  %v98_v4 = vld [vmem:[%s354_s3 + $0x30] sm:$0xff]  ;;  %vm104_vm2 = vcmask 523264   ;;  %vm164_vm3 = vcmask 23552  }
   0xd   :  { %116 = vmatpush.msra.mxu1 %v99_v3  ;;  %v97_v5 = vld [vmem:[%s354_s3 + $0x28] sm:$0xff]  ;;  %v96_v6 = vld [vmem:[%s354_s3 + $0x20] sm:$0xff]  ;;  %v95_v7 = vld [vmem:[%s354_s3 + $0x18] sm:$0xff] }
   0xe   :  { %86 = vmatpush.msra.mxu0 %v57_v1  ;;  %v94_v8 = vld [vmem:[%s354_s3 + $0x10] sm:$0xff]  ;;  %v93_v9 = vld [vmem:[%s354_s3 + $0x8] sm:$0xff]  ;;  %v92_v10 = vld [vmem:[%s354_s3] sm:$0xff] }
   0xf   :  { %173 = vmatmul.msk.f32.vlgmr.msra.gmra.mxu0 %vm63_vm1, %v56_v2  ;;  %117 = vmatpush.msra.mxu1 %v98_v4  ;;  %v136_v11 = vld [vmem:[%s356_s5 + $0x38] sm:$0xff]  ;;  %v135_v12 = vld [vmem:[%s356_s5 + $0x30] sm:$0xff]  ;;  %v134_v13 = vld [vmem:[%s356_s5 + $0x28] sm:$0xff] }
  0x10   :  { %152 = vmatpush.msra.mxu2 %v136_v11  ;;  %v180_v14 = vld [vmem:[%s353_s2] ss:$0 sm:$0xff]  ;;  %v132_v19 = vld [vmem:[%s356_s5 + $0x18] sm:$0xff]  ;;  %v131_v20 = vld [vmem:[%s356_s5 + $0x10] sm:$0xff] }
  0x11   :  { %118 = vmatpush.msra.mxu1 %v97_v5  ;;  %v133_v18 = vld [vmem:[%s356_s5 + $0x20] sm:$0xff]  ;;  %v130_v21 = vld [vmem:[%s356_s5 + $0x8] sm:$0xff] }
  0x12   :  { %153 = vmatpush.msra.mxu2 %v135_v12  ;;  %v129_v22 = vld [vmem:[%s356_s5] sm:$0xff] }
  0x13   :  { %119 = vmatpush.msra.mxu1 %v96_v6  ;;  %v181_v23 = vld [vmem:[%s355_s4] ss:$0 sm:$0xff] }
  0x14   :  { %154 = vmatpush.msra.mxu2 %v134_v13  ;;  %v182_v27 = vld [vmem:[%s357_s6] ss:$0 sm:$0xff] }
  0x15   :  { %120 = vmatpush.msra.mxu1 %v95_v7 }
  0x16   :  { %155 = vmatpush.msra.mxu2 %v133_v18 }
  0x17   :  { %121 = vmatpush.msra.mxu1 %v94_v8 }
  0x18   :  { %156 = vmatpush.msra.mxu2 %v132_v19 }
  0x19   :  { %122 = vmatpush.msra.mxu1 %v93_v9 }
  0x1a   :  { %157 = vmatpush.msra.mxu2 %v131_v20 }
  0x1b   :  { %123 = vmatpush.msra.mxu1 %v92_v10 }
  0x1c   :  { %158 = vmatpush.msra.mxu2 %v130_v21 }
  0x1e   :  { %159 = vmatpush.msra.mxu2 %v129_v22 }
  0x8c   :  { %v88_v15 = vpop.f32.mrf.mxu0 }
  0x8d   :  { %v89_v16 = vadd.f32 %v180_v14, %v88_v15 }
  0x8f   :  { %183 = vtanh.f32 %v89_v16 }
  0x95   :  { %v184_v17 = vpop.eup %183 }
  0x96   :  { %174 = vmatmul.msk.f32.vlgmr.msra.gmra.mxu1 %vm104_vm2, %v184_v17 }
 0x113   :  { %v125_v24 = vpop.f32.mrf.mxu1 }
 0x114   :  { %v126_v25 = vadd.f32 %v181_v23, %v125_v24 }
 0x116   :  { %185 = vtanh.f32 %v126_v25 }
 0x11c   :  { %v186_v26 = vpop.eup %185 }
 0x11d   :  { %175 = vmatmul.msk.f32.vlgmr.msra.gmra.mxu2 %vm104_vm2, %v186_v26 }
 0x1a0   :  { %v161_v28 = vpop.f32.mrf.mxu2 }
 0x1a1   :  { %v162_v29 = vadd.f32 %v182_v27, %v161_v28 }
 0x1a3   :  { %165 = vst.msk [vmem:[%s358_s7] sm:$0xff] %vm164_vm3, %v162_v29 }
 0x1a4   :  { %170 = vsyncpa [#allocation3], 1 }
 0x1a5   :  { %171 = vsyncpa [#allocation5], 1 }

</bundles_post_ra>
